<compile_context>
chip_gen: v7x
topology: tpu7x:2x2x1
jax: 0.10.0
libtpu: 0.0.40
codegen_flags: <defaults>
</compile_context>

<pallas_src>
import functools

import jax
import jax.numpy as jnp
from jax import lax
from jax.experimental import pallas as pl
from jax.experimental.pallas import tpu as pltpu


# ---------------------------------------------------------------------------
# Hardware-aware tiling helpers
# ---------------------------------------------------------------------------

_MAX_ROWS = 8192  # keep the grid multi-step on very tall inputs


@functools.lru_cache(maxsize=1)
def _chip_config():
    """Returns (target_tile_bytes_fp32, vmem_limit_cap, min_parallel_grid)."""
    vmem_cap = 128 << 20
    try:
        info = pltpu.get_tpu_info()
        vmem_cap = int(getattr(info, "vmem_capacity_bytes", vmem_cap) or vmem_cap)
    except Exception:
        pass
    if vmem_cap <= (65 << 20):
        # v7x-class: 64 MiB VMEM per TC, 2 TCs sharing HBM -> smaller tiles,
        # tighter VMEM limit, and at least 2 grid steps for megacore sharding.
        return (2 << 20, 40 << 20, 2)
    # v5e / v6e: 128 MiB VMEM, single TensorCore.
    return (4 << 20, 48 << 20, 1)


def _sublane(dtype):
    """Sublane packing of the second-to-last dim for this dtype (8/16/32)."""
    return max(8, 32 // jnp.dtype(dtype).itemsize)


def _vmem_limit(block_elems, itemsize, cap):
    """Double-buffered in + out tiles plus fp32 temporaries + headroom."""
    native = block_elems * itemsize
    f32 = block_elems * 4
    need = 4 * native + 4 * f32 + (2 << 20)
    return int(min(max(need, 16 << 20), cap))


def _choose_block_rows(n_rows, row_bytes_f32, sublane, target_bytes, min_grid):
    """Row-tile height bounded by fp32 tile bytes (no fixed row floor)."""
    rows = max(target_bytes // max(row_bytes_f32, 1), sublane)
    rows = min(rows, _MAX_ROWS)
    if min_grid > 1:
        rows = min(rows, max(pl.cdiv(n_rows, min_grid), 1))  # >= min_grid steps
    if rows >= n_rows:
        return int(n_rows)                                    # full extent is legal
    rows = max((rows // sublane) * sublane, sublane)
    return int(min(rows, n_rows))


def _choose_block_lanes(n_lanes, lane_bytes_f32, target_bytes):
    """Lane-tile width: multiple of 128 or the full extent."""
    lanes = max(target_bytes // max(lane_bytes_f32, 1), 128)
    if lanes >= n_lanes:
        return int(n_lanes)
    return int(max((lanes // 128) * 128, 128))


# ---------------------------------------------------------------------------
# Kernels
# ---------------------------------------------------------------------------

def _ln_rows_kernel(x_ref, w_ref, b_ref, o_ref, *, eps, inv_c):
    """LayerNorm over the lane (last) axis.  x_ref: (br, C); w/b: (1, C) fp32."""
    x = x_ref[...].astype(jnp.float32)
    mean = jnp.sum(x, axis=-1, keepdims=True) * inv_c
    xc = x - mean
    var = jnp.sum(xc * xc, axis=-1, keepdims=True) * inv_c    # two-pass variance
    y = xc * lax.rsqrt(var + eps) * w_ref[...] + b_ref[...]
    o_ref[...] = y.astype(o_ref.dtype)


def _ln_rows_packed_kernel(x_ref, w_ref, b_ref, seg_ref, o_ref, *, eps, inv_c):
    """Lane-dense LayerNorm for small C (C | 128): k = 128 // C rows per lane row.

    x_ref:  (br, 128) holding k logical rows of C channels each.
    seg_ref:(128, 128) block-diagonal ones matrix; x @ seg puts, in every lane,
            the sum over that lane's C-wide segment (runs on the idle MXU).
    w_ref / b_ref: (1, 128) = weight / bias tiled k times.
    """
    x = x_ref[...].astype(jnp.float32)
    seg = seg_ref[...]
    mean = jnp.dot(x, seg, precision=lax.Precision.HIGHEST,
                   preferred_element_type=jnp.float32) * inv_c
    xc = x - mean
    var = jnp.dot(xc * xc, seg, precision=lax.Precision.HIGHEST,
                  preferred_element_type=jnp.float32) * inv_c  # two-pass variance
    y = xc * lax.rsqrt(var + eps) * w_ref[...] + b_ref[...]
    o_ref[...] = y.astype(o_ref.dtype)


def _ln_cf_kernel(x_ref, w_ref, b_ref, o_ref, *, eps, inv_c):
    """LayerNorm over the channel (sublane) axis.  x_ref: (nb, C, thw)."""
    x = x_ref[...].astype(jnp.float32)
    mean = jnp.sum(x, axis=1, keepdims=True) * inv_c
    xc = x - mean
    var = jnp.sum(xc * xc, axis=1, keepdims=True) * inv_c      # two-pass variance
    y = xc * lax.rsqrt(var + eps) * w_ref[...] + b_ref[...]
    o_ref[...] = y.astype(o_ref.dtype)


# ---------------------------------------------------------------------------
# Wrappers
# ---------------------------------------------------------------------------

def _layer_norm_rows_plain(x2d, weight, bias, eps):
    N, C = x2d.shape
    itemsize = jnp.dtype(x2d.dtype).itemsize
    target, vmem_cap, min_grid = _chip_config()
    br = _choose_block_rows(N, C * 4, _sublane(x2d.dtype), target, min_grid)
    grid = (pl.cdiv(N, br),)

    w2 = weight.reshape(1, C).astype(jnp.float32)
    b2 = bias.reshape(1, C).astype(jnp.float32)

    return pl.pallas_call(
        functools.partial(_ln_rows_kernel, eps=eps, inv_c=1.0 / C),
        out_shape=jax.ShapeDtypeStruct((N, C), x2d.dtype),
        grid_spec=pltpu.PrefetchScalarGridSpec(
            num_scalar_prefetch=0,
            grid=grid,
            in_specs=[
                pl.BlockSpec((br, C), lambda i: (i, 0)),
                pl.BlockSpec((1, C), lambda i: (0, 0)),
                pl.BlockSpec((1, C), lambda i: (0, 0)),
            ],
            out_specs=pl.BlockSpec((br, C), lambda i: (i, 0)),
        ),
        compiler_params=pltpu.CompilerParams(
            dimension_semantics=("parallel",),
            vmem_limit_bytes=_vmem_limit(br * C, itemsize, vmem_cap)),
    )(x2d, w2, b2)


def _layer_norm_rows_packed(x2d, weight, bias, eps, k):
    N, C = x2d.shape
    kc = k * C                                   # == 128 by construction
    rows = N // k
    itemsize = jnp.dtype(x2d.dtype).itemsize
    target, vmem_cap, min_grid = _chip_config()
    br = _choose_block_rows(rows, kc * 4, _sublane(x2d.dtype), target, min_grid)
    grid = (pl.cdiv(rows, br),)

    xp = x2d.reshape(rows, kc)                   # contiguous -> metadata-only
    wt = jnp.tile(weight.astype(jnp.float32), (k,)).reshape(1, kc)
    bt = jnp.tile(bias.astype(jnp.float32), (k,)).reshape(1, kc)
    seg_idx = jnp.arange(kc, dtype=jnp.int32) // C
    seg = (seg_idx[:, None] == seg_idx[None, :]).astype(jnp.float32)  # (kc, kc)

    out = pl.pallas_call(
        functools.partial(_ln_rows_packed_kernel, eps=eps, inv_c=1.0 / C),
        out_shape=jax.ShapeDtypeStruct((rows, kc), x2d.dtype),
        grid_spec=pltpu.PrefetchScalarGridSpec(
            num_scalar_prefetch=0,
            grid=grid,
            in_specs=[
                pl.BlockSpec((br, kc), lambda i: (i, 0)),
                pl.BlockSpec((1, kc), lambda i: (0, 0)),
                pl.BlockSpec((1, kc), lambda i: (0, 0)),
                pl.BlockSpec((kc, kc), lambda i: (0, 0)),   # resident constant
            ],
            out_specs=pl.BlockSpec((br, kc), lambda i: (i, 0)),
        ),
        compiler_params=pltpu.CompilerParams(
            dimension_semantics=("parallel",),
            vmem_limit_bytes=_vmem_limit(br * kc, itemsize, vmem_cap)),
    )(xp, wt, bt, seg)
    return out.reshape(N, C)


def _layer_norm_rows(x2d, weight, bias, eps):
    """channels_last path: normalize rows of a (N, C) slab over the lane axis."""
    N, C = x2d.shape
    if 0 < C < 128 and 128 % C == 0:
        k = 128 // C
        if k > 1 and N % k == 0:
            return _layer_norm_rows_packed(x2d, weight, bias, eps, k)
        # TODO(synk): process the N % k tail rows separately instead of falling
        # back to the masked-store path for the whole array.
    return _layer_norm_rows_plain(x2d, weight, bias, eps)


def _layer_norm_channels_first(x, weight, bias, eps):
    """LayerNorm over channel dim of an NCHW tensor, no HBM transposes."""
    B, C, H, W = x.shape
    HW = H * W
    itemsize = jnp.dtype(x.dtype).itemsize
    target, vmem_cap, min_grid = _chip_config()

    x3 = x.reshape(B, C, HW)                      # contiguous -> metadata-only
    thw = _choose_block_lanes(HW, C * 4, target)
    n_hw_tiles = pl.cdiv(HW, thw)

    nb = 1
    if thw == HW:                                 # small spatial: batch images
        per_img = C * HW * 4
        nb = int(min(max(target // max(per_img, 1), 1), B))
        if min_grid > 1 and n_hw_tiles == 1 and B > 1:
            nb = min(nb, max(pl.cdiv(B, min_grid), 1))   # keep both TCs busy
    grid = (pl.cdiv(B, nb), n_hw_tiles)

    w3 = weight.reshape(1, C, 1).astype(jnp.float32)
    b3 = bias.reshape(1, C, 1).astype(jnp.float32)

    out = pl.pallas_call(
        functools.partial(_ln_cf_kernel, eps=eps, inv_c=1.0 / C),
        out_shape=jax.ShapeDtypeStruct((B, C, HW), x.dtype),
        grid_spec=pltpu.PrefetchScalarGridSpec(
            num_scalar_prefetch=0,
            grid=grid,
            in_specs=[
                pl.BlockSpec((nb, C, thw), lambda b, t: (b, 0, t)),
                pl.BlockSpec((1, C, 1), lambda b, t: (0, 0, 0)),
                pl.BlockSpec((1, C, 1), lambda b, t: (0, 0, 0)),
            ],
            out_specs=pl.BlockSpec((nb, C, thw), lambda b, t: (b, 0, t)),
        ),
        compiler_params=pltpu.CompilerParams(
            dimension_semantics=("parallel", "parallel"),
            vmem_limit_bytes=_vmem_limit(nb * C * thw, itemsize, vmem_cap)),
    )(x3, w3, b3)
    return out.reshape(B, C, H, W)


# ---------------------------------------------------------------------------
# Module wrapper (mirrors the PyTorch LayerNorm)
# ---------------------------------------------------------------------------

class LayerNormPallas:
    """LayerNorm supporting channels_last (..., C) and channels_first (B, C, H, W)."""

    def __init__(self, normalized_shape, eps=1e-6, data_format="channels_last"):
        if data_format not in ("channels_last", "channels_first"):
            raise NotImplementedError
        # Deterministic init, matching nn.Parameter(torch.ones/zeros(...)).
        self.weight = jnp.ones((normalized_shape,), jnp.float32)
        self.bias = jnp.zeros((normalized_shape,), jnp.float32)
        self.eps = eps
        self.data_format = data_format
        self.normalized_shape = (normalized_shape,)

    def __call__(self, x):
        C = self.normalized_shape[0]
        if self.data_format == "channels_last":
            shape = x.shape
            assert shape[-1] == C
            y = _layer_norm_rows(x.reshape(-1, C), self.weight, self.bias, self.eps)
            return y.reshape(shape)
        else:
            assert x.shape[1] == C
            return _layer_norm_channels_first(x, self.weight, self.bias, self.eps)


# ---------------------------------------------------------------------------
# References + self-test
# ---------------------------------------------------------------------------

def _ref_layernorm_last(x, w, b, eps):
    mean = jnp.mean(x, axis=-1, keepdims=True)
    var = jnp.mean((x - mean) ** 2, axis=-1, keepdims=True)
    return (x - mean) / jnp.sqrt(var + eps) * w + b


def _ref_layernorm_channels_first(x, w, b, eps):
    u = jnp.mean(x, axis=1, keepdims=True)
    s = jnp.mean((x - u) ** 2, axis=1, keepdims=True)
    xn = (x - u) / jnp.sqrt(s + eps)
    return w[None, :, None, None] * xn + b[None, :, None, None]


if __name__ == "__main__":
    key = jax.random.PRNGKey(0)
    k1, k2, k3 = jax.random.split(key, 3)
    eps = 1e-6

    # channels_first (NCHW): sublane-reduction kernel with multi-image blocks.
    B, C, H, W = 2, 32, 8, 8
    x_cf = jax.random.normal(k1, (B, C, H, W), dtype=jnp.float32)
    ln_cf = LayerNormPallas(C, eps=eps, data_format="channels_first")
    y_cf = jax.block_until_ready(ln_cf(x_cf))
    ref_cf = _ref_layernorm_channels_first(x_cf, ln_cf.weight, ln_cf.bias, eps)
    assert y_cf.shape == (B, C, H, W)
    assert jnp.allclose(y_cf, ref_cf, atol=1e-4, rtol=1e-4)

    # channels_last (NHWC), C=32: lane-dense packed kernel (4 rows / 128 lanes).
    x_cl = jax.random.normal(k2, (2, 8, 8, 32), dtype=jnp.float32)
    ln_cl = LayerNormPallas(32, eps=eps, data_format="channels_last")
    y_cl = jax.block_until_ready(ln_cl(x_cl))
    ref_cl = _ref_layernorm_last(x_cl, ln_cl.weight, ln_cl.bias, eps)
    assert y_cl.shape == x_cl.shape
    assert jnp.allclose(y_cl, ref_cl, atol=1e-4, rtol=1e-4)

    # channels_last, C=48 (128 % C != 0): plain lane-reduction kernel.
    x_cl2 = jax.random.normal(k3, (2, 4, 4, 48), dtype=jnp.float32)
    ln_cl2 = LayerNormPallas(48, eps=eps, data_format="channels_last")
    y_cl2 = jax.block_until_ready(ln_cl2(x_cl2))
    ref_cl2 = _ref_layernorm_last(x_cl2, ln_cl2.weight, ln_cl2.bias, eps)
    assert jnp.allclose(y_cl2, ref_cl2, atol=1e-4, rtol=1e-4)

    print("KERNEL_OK")
</pallas_src>

<mosaic_0001>
module attributes {stable_mosaic.version = 11 : i64} {
  func.func @_ln_cf_kernel(%arg0: i32, %arg1: i32, %arg2: memref<2x32x64xf32, #tpu.memory_space<vmem>>, %arg3: memref<1x32x1xf32, #tpu.memory_space<vmem>>, %arg4: memref<1x32x1xf32, #tpu.memory_space<vmem>>, %arg5: memref<2x32x64xf32, #tpu.memory_space<vmem>>) attributes {dimension_semantics = [#tpu.dimension_semantics<parallel>, #tpu.dimension_semantics<parallel>], iteration_bounds = array<i64: 1, 1>, scalar_prefetch = 0 : i64, scratch_operands = 0 : i64, tpu.core_type = #tpu.core_type<tc>, window_params = [{transform_indices = @transform_0, window_bounds = array<i64: 2, 32, 64>}, {pipeline_mode = #tpu.pipeline_mode<synchronous>, transform_indices = @transform_1, window_bounds = array<i64: 1, 32, 1>}, {pipeline_mode = #tpu.pipeline_mode<synchronous>, transform_indices = @transform_2, window_bounds = array<i64: 1, 32, 1>}, {transform_indices = @transform_3, window_bounds = array<i64: 2, 32, 64>}]} {
    %c0 = arith.constant 0 : index
    %c0_0 = arith.constant 0 : index
    %c0_1 = arith.constant 0 : index
    %0 = vector.load %arg2[%c0, %c0_0, %c0_1] : memref<2x32x64xf32, #tpu.memory_space<vmem>>, vector<2x32x64xf32>
    %cst = arith.constant dense<0.000000e+00> : vector<2x64xf32>
    %1 = vector.multi_reduction <add>, %0, %cst [1] : vector<2x32x64xf32> to vector<2x64xf32>
    %2 = vector.shape_cast %1 : vector<2x64xf32> to vector<2x1x64xf32>
    %cst_2 = arith.constant 3.125000e-02 : f32
    %3 = vector.broadcast %cst_2 : f32 to vector<2x1x64xf32>
    %4 = arith.mulf %2, %3 : vector<2x1x64xf32>
    %5 = vector.broadcast %4 : vector<2x1x64xf32> to vector<2x32x64xf32>
    %6 = arith.subf %0, %5 : vector<2x32x64xf32>
    %7 = arith.mulf %6, %6 : vector<2x32x64xf32>
    %cst_3 = arith.constant dense<0.000000e+00> : vector<2x64xf32>
    %8 = vector.multi_reduction <add>, %7, %cst_3 [1] : vector<2x32x64xf32> to vector<2x64xf32>
    %9 = vector.shape_cast %8 : vector<2x64xf32> to vector<2x1x64xf32>
    %cst_4 = arith.constant 3.125000e-02 : f32
    %10 = vector.broadcast %cst_4 : f32 to vector<2x1x64xf32>
    %11 = arith.mulf %9, %10 : vector<2x1x64xf32>
    %cst_5 = arith.constant 9.99999997E-7 : f32
    %12 = vector.broadcast %cst_5 : f32 to vector<2x1x64xf32>
    %13 = arith.addf %11, %12 : vector<2x1x64xf32>
    %14 = math.rsqrt %13 : vector<2x1x64xf32>
    %15 = vector.broadcast %14 : vector<2x1x64xf32> to vector<2x32x64xf32>
    %16 = arith.mulf %6, %15 : vector<2x32x64xf32>
    %c0_6 = arith.constant 0 : index
    %c0_7 = arith.constant 0 : index
    %c0_8 = arith.constant 0 : index
    %17 = vector.load %arg3[%c0_6, %c0_7, %c0_8] : memref<1x32x1xf32, #tpu.memory_space<vmem>>, vector<1x32x1xf32>
    %18 = vector.broadcast %17 : vector<1x32x1xf32> to vector<2x32x64xf32>
    %19 = arith.mulf %16, %18 : vector<2x32x64xf32>
    %c0_9 = arith.constant 0 : index
    %c0_10 = arith.constant 0 : index
    %c0_11 = arith.constant 0 : index
    %20 = vector.load %arg4[%c0_9, %c0_10, %c0_11] : memref<1x32x1xf32, #tpu.memory_space<vmem>>, vector<1x32x1xf32>
    %21 = vector.broadcast %20 : vector<1x32x1xf32> to vector<2x32x64xf32>
    %22 = arith.addf %19, %21 : vector<2x32x64xf32>
    %c0_12 = arith.constant 0 : index
    %c0_13 = arith.constant 0 : index
    %c0_14 = arith.constant 0 : index
    %23 = vector.load %arg5[%c0_12, %c0_13, %c0_14] : memref<2x32x64xf32, #tpu.memory_space<vmem>>, vector<2x32x64xf32>
    tpu.vector_store %arg5[%c0_12, %c0_13, %c0_14], %22 {strides = array<i32>} : memref<2x32x64xf32, #tpu.memory_space<vmem>>, vector<2x32x64xf32>,
    return
  }
  func.func @transform_0(%arg0: i32, %arg1: i32) -> (i32, i32, i32) {
    %c0_i32 = arith.constant 0 : i32
    %c0_i32_0 = arith.constant 0 : i32
    return %arg0, %c0_i32, %arg1 : i32, i32, i32
  }
  func.func @transform_1(%arg0: i32, %arg1: i32) -> (i32, i32, i32) {
    %c0_i32 = arith.constant 0 : i32
    %c0_i32_0 = arith.constant 0 : i32
    %c0_i32_1 = arith.constant 0 : i32
    %c0_i32_2 = arith.constant 0 : i32
    return %c0_i32, %c0_i32_0, %c0_i32_1 : i32, i32, i32
  }
  func.func @transform_2(%arg0: i32, %arg1: i32) -> (i32, i32, i32) {
    %c0_i32 = arith.constant 0 : i32
    %c0_i32_0 = arith.constant 0 : i32
    %c0_i32_1 = arith.constant 0 : i32
    %c0_i32_2 = arith.constant 0 : i32
    return %c0_i32, %c0_i32_0, %c0_i32_1 : i32, i32, i32
  }
  func.func @transform_3(%arg0: i32, %arg1: i32) -> (i32, i32, i32) {
    %c0_i32 = arith.constant 0 : i32
    %c0_i32_0 = arith.constant 0 : i32
    return %arg0, %c0_i32, %arg1 : i32, i32, i32
  }
}

</mosaic_0001>

<bundles_post_ra>
// kernel: tpu_custom_call.1
= control target key start
LH: loop header
LB: loop body
LE: loop exit
PB: predicated region body
PF: predicated region fallthrough
CT: control target
= control target key end

     0   :  { %v230_v2 = vmov 0   ;;  %s338_s0 = inlined_call_operand.vmem [shape: f32[2,32,64], index: 0, kind: input, shape index: {}]   ;;  %s339_s1 = inlined_call_operand.vmem [shape: f32[1,32,1], index: 1, kind: input, shape index: {}]   ;;  %s340_s2 = inlined_call_operand.vmem [shape: f32[1,32,1], index: 2, kind: input, shape index: {}]   ;;  %s341_s3 = inlined_call_operand.hbm [shape: f32[2,32,64], index: 3, kind: output, shape index: {}]  }
   0x1   :  { %v110_v0 = vld [vmem:[%s339_s1 + $0x10] sm:$0xff]  ;;  %v108_v1 = vld [vmem:[%s339_s1] sm:$0xff]  ;;  %201 = vset.pattern.permute.xlu1 %v230_v2  ;;  %200 = vset.pattern.permute.xlu0 %v230_v2  ;;  %v111_v3 = vld [vmem:[%s339_s1 + $0x18] sm:$0xff] }
   0x2   :  { %124 = vperm.xlu1 %201, %v110_v0   ;;  %114 = vperm.xlu0 %200, %v108_v1   ;;  %v109_v4 = vld [vmem:[%s339_s1 + $0x8] sm:$0xff] }
   0x3   :  { %8 = vsyncpa [#allocation3], 0  ;;  %v141_v5 = vld [vmem:[%s340_s2 + $0x8] sm:$0xff]  ;;  %v140_v6 = vld [vmem:[%s340_s2] sm:$0xff]  ;;  %vm23_vm0 = vcmask 523264  }
   0x4   :  { %v143_v7 = vld [vmem:[%s340_s2 + $0x18] sm:$0xff]  ;;  %v142_v8 = vld [vmem:[%s340_s2 + $0x10] sm:$0xff]  ;;  %v15_v9 = vld [vmem:[%s338_s0] sm:$0xff] }
   0x5   :  { %v16_v10 = vld [vmem:[%s338_s0 + $0x8] sm:$0xff]  ;;  %v19_v11 = vld [vmem:[%s338_s0 + $0x20] sm:$0xff]  ;;  %v24_v13 = vsel %vm23_vm0, %v15_v9, 0.0  ;;  %v17_v15 = vld [vmem:[%s338_s0 + $0x10] sm:$0xff] }
   0x6   :  { %129 = vperm.xlu1 %201, %v111_v3   ;;  %119 = vperm.xlu0 %200, %v109_v4   ;;  %v20_v12 = vld [vmem:[%s338_s0 + $0x28] sm:$0xff]  ;;  %v25_v14 = vsel %vm23_vm0, %v16_v10, 0.0  ;;  %v37_v16 = vsel %vm23_vm0, %v19_v11, 0.0  ;;  %v21_v18 = vld [vmem:[%s338_s0 + $0x30] sm:$0xff]  ;;  %v27_v20 = vsel %vm23_vm0, %v17_v15, 0.0  ;;  %v18_v22 = vld [vmem:[%s338_s0 + $0x18] sm:$0xff] }
   0x7   :  { %v38_v17 = vsel %vm23_vm0, %v20_v12, 0.0  ;;  %v26_v19 = vadd.f32 %v25_v14, %v24_v13  ;;  %v40_v23 = vsel %vm23_vm0, %v21_v18, 0.0  ;;  %v22_v24 = vld [vmem:[%s338_s0 + $0x38] sm:$0xff]  ;;  %v29_v26 = vsel %vm23_vm0, %v18_v22, 0.0  ;;  %s231_s0 = smov [#allocation2]  }
   0x8   :  { %v39_v21 = vadd.f32 %v38_v17, %v37_v16  ;;  %v42_v28 = vsel %vm23_vm0, %v22_v24, 0.0  ;;  %s185_s15 = sshll.u32 %s231_s0, 4  ;;  %s186_s15 = int_to_ptr.vmem [resolvable:$true] %s185_s15 }
   0x9   :  { %v28_v25 = vadd.f32 %v27_v20, %v26_v19  ;;  %s206_s16 = scalar_lea.vmem %s186_s15, 1024  ;;  %p211_p1 = scmp.lt.s32.totalorder %s186_s15, %s186_s15 }
   0xa   :  { %151 = vperm.xlu1 %201, %v141_v5   ;;  %146 = vperm.xlu0 %200, %v140_v6   ;;  %v41_v27 = vadd.f32 %v40_v23, %v39_v21  ;;  %p207_p0 = scmp.ne.s32.totalorder %s186_s15, %s206_s16  ;;  %p212_p2 = scmp.lt.s32.totalorder %s206_s16, %s206_s16 }
   0xb   :  { %v30_v29 = vadd.f32 %v29_v26, %v28_v25 }
   0xc   :  { %v43_v30 = vadd.f32 %v42_v28, %v41_v27  ;;  %p213_p3 = por %p212_p2, %p211_p1 }
   0xd   :  { %v31_v31 = vrot.slane %v30_v29, 4 }
   0xe   :  { %161 = vperm.xlu1 %201, %v143_v7   ;;  %156 = vperm.xlu0 %200, %v142_v8   ;;  %v44_v32 = vrot.slane %v43_v30, 4  ;;  %p214_p4 = pnand %p213_p3, %p207_p0 }
   0xf   :  { %v32_v33 = vadd.f32 %v31_v31, %v30_v29 }
  0x10   :  { %v45_v34 = vadd.f32 %v44_v32, %v43_v30 }
  0x11   :  { %v33_v35 = vrot.slane %v32_v33, 2 }
  0x12   :  { %v46_v36 = vrot.slane %v45_v34, 2 }
  0x13   :  { %v34_v37 = vadd.f32 %v33_v35, %v32_v33 }
  0x14   :  { %v47_v38 = vadd.f32 %v46_v36, %v45_v34 }
  0x15   :  { %v35_v39 = vrot.slane %v34_v37, 1 }
  0x16   :  { %v48_v40 = vrot.slane %v47_v38, 1 }
  0x17   :  { %v36_v41 = vadd.f32 %v35_v39, %v34_v37 }
  0x18   :  { %v49_v42 = vadd.f32 %v48_v40, %v47_v38 }
  0x19   :  { %v50_v43 = vmul.f32 0.03125, %v36_v41 }
  0x1a   :  { %v51_v44 = vmul.f32 0.03125, %v49_v42 }
  0x1b   :  { %v52_v45 = vsub.f32 %v15_v9, %v50_v43  ;;  %v53_v46 = vsub.f32 %v16_v10, %v50_v43  ;;  %v54_v49 = vsub.f32 %v17_v15, %v50_v43  ;;  %v55_v55 = vsub.f32 %v18_v22, %v50_v43 }
  0x1c   :  { %v56_v47 = vsub.f32 %v19_v11, %v51_v44  ;;  %v57_v48 = vsub.f32 %v20_v12, %v51_v44  ;;  %v58_v52 = vsub.f32 %v21_v18, %v51_v44  ;;  %v59_v59 = vsub.f32 %v22_v24, %v51_v44 }
  0x1d   :  { %v60_v50 = vmul.f32 %v52_v45, %v52_v45  ;;  %v61_v51 = vmul.f32 %v53_v46, %v53_v46  ;;  %v62_v56 = vmul.f32 %v54_v49, %v54_v49  ;;  %v63_v0 = vmul.f32 %v55_v55, %v55_v55 }
  0x1e   :  { %v64_v53 = vmul.f32 %v56_v47, %v56_v47  ;;  %v65_v54 = vmul.f32 %v57_v48, %v57_v48  ;;  %v66_v60 = vmul.f32 %v58_v52, %v58_v52  ;;  %v67_v3 = vmul.f32 %v59_v59, %v59_v59 }
  0x1f   :  { %v68_v57 = vsel %vm23_vm0, %v60_v50, 0.0  ;;  %v69_v58 = vsel %vm23_vm0, %v61_v51, 0.0  ;;  %v71_v1 = vsel %vm23_vm0, %v62_v56, 0.0  ;;  %v73_v6 = vsel %vm23_vm0, %v63_v0, 0.0 }
  0x20   :  { %v81_v61 = vsel %vm23_vm0, %v64_v53, 0.0  ;;  %v82_v62 = vsel %vm23_vm0, %v65_v54, 0.0  ;;  %v70_v63 = vadd.f32 %v69_v58, %v68_v57  ;;  %v84_v4 = vsel %vm23_vm0, %v66_v60, 0.0 }
  0x21   :  { %v83_v2 = vadd.f32 %v82_v62, %v81_v61  ;;  %v86_v8 = vsel %vm23_vm0, %v67_v3, 0.0 }
  0x22   :  { %v72_v5 = vadd.f32 %v71_v1, %v70_v63 }
  0x23   :  { %v85_v7 = vadd.f32 %v84_v4, %v83_v2 }
  0x24   :  { %v74_v9 = vadd.f32 %v73_v6, %v72_v5 }
  0x25   :  { %v87_v10 = vadd.f32 %v86_v8, %v85_v7 }
  0x26   :  { %v75_v11 = vrot.slane %v74_v9, 4 }
  0x27   :  { %v88_v12 = vrot.slane %v87_v10, 4 }
  0x28   :  { %v76_v13 = vadd.f32 %v75_v11, %v74_v9 }
  0x29   :  { %v89_v14 = vadd.f32 %v88_v12, %v87_v10 }
  0x2a   :  { %v77_v15 = vrot.slane %v76_v13, 2 }
  0x2b   :  { %v90_v16 = vrot.slane %v89_v14, 2 }
  0x2c   :  { %v78_v17 = vadd.f32 %v77_v15, %v76_v13 }
  0x2d   :  { %v91_v18 = vadd.f32 %v90_v16, %v89_v14 }
  0x2e   :  { %v79_v19 = vrot.slane %v78_v17, 1 }
  0x2f   :  { %v92_v20 = vrot.slane %v91_v18, 1 }
  0x30   :  { %v80_v21 = vadd.f32 %v79_v19, %v78_v17 }
  0x31   :  { %v93_v22 = vadd.f32 %v92_v20, %v91_v18 }
  0x32   :  { %v94_v23 = vmul.f32 0.03125, %v80_v21 }
  0x33   :  { %v95_v24 = vmul.f32 0.03125, %v93_v22 }
  0x34   :  { %v96_v25 = vadd.f32 1e-06, %v94_v23 }
  0x35   :  { %v97_v26 = vadd.f32 1e-06, %v95_v24 }
  0x36   :  { %202 = vrsqrt.f32 %v96_v25 }
  0x37   :  { %204 = vrsqrt.f32 %v97_v26 }
  0x40   :  { %v203_v27 = vpop.eup %202 }
  0x41   :  { %v205_v28 = vpop.eup %204  ;;  %v100_v31 = vmul.f32 %v203_v27, %v52_v45  ;;  %v101_v33 = vmul.f32 %v203_v27, %v53_v46  ;;  %v102_v37 = vmul.f32 %v203_v27, %v54_v49  ;;  %v103_v39 = vmul.f32 %v203_v27, %v55_v55 }
  0x42   :  { %v104_v32 = vmul.f32 %v205_v28, %v56_v47  ;;  %v105_v34 = vmul.f32 %v205_v28, %v57_v48  ;;  %v106_v38 = vmul.f32 %v205_v28, %v58_v52  ;;  %v107_v40 = vmul.f32 %v205_v28, %v59_v59 }
  0x81   :  { %v125_v29 = vpop.permute.xlu1 %124  ;;  %v115_v30 = vpop.permute.xlu0 %114 }
  0x82   :  { %v132_v41 = vmul.f32 %v115_v30, %v100_v31  ;;  %v136_v42 = vmul.f32 %v115_v30, %v104_v32  ;;  %v134_v45 = vmul.f32 %v125_v29, %v102_v37  ;;  %v138_v46 = vmul.f32 %v125_v29, %v106_v38 }
  0x85   :  { %v130_v35 = vpop.permute.xlu1 %129  ;;  %v120_v36 = vpop.permute.xlu0 %119 }
  0x86   :  { %v133_v43 = vmul.f32 %v120_v36, %v101_v33  ;;  %v137_v44 = vmul.f32 %v120_v36, %v105_v34  ;;  %v135_v47 = vmul.f32 %v130_v35, %v103_v39  ;;  %v139_v48 = vmul.f32 %v130_v35, %v107_v40 }
  0x89   :  { %v152_v50 = vpop.permute.xlu1 %151  ;;  %v147_v51 = vpop.permute.xlu0 %146 }
  0x8a   :  { %v165_v53 = vadd.f32 %v152_v50, %v133_v43  ;;  %v169_v54 = vadd.f32 %v152_v50, %v137_v44  ;;  %v164_v56 = vadd.f32 %v147_v51, %v132_v41  ;;  %v168_v57 = vadd.f32 %v147_v51, %v136_v42 }
  0x8c   :  { %173 = vst.msk [vmem:[#allocation2 + $0x8] sm:$0xff] %vm23_vm0, %v165_v53  ;;  %177 = vst.msk [vmem:[#allocation2 + $0x28] sm:$0xff] %vm23_vm0, %v169_v54 }
  0x8d   :  { %172 = vst.msk [vmem:[#allocation2] sm:$0xff] %vm23_vm0, %v164_v56  ;;  %176 = vst.msk [vmem:[#allocation2 + $0x20] sm:$0xff] %vm23_vm0, %v168_v57  ;;  %v162_v49 = vpop.permute.xlu1 %161  ;;  %v157_v52 = vpop.permute.xlu0 %156 }
  0x8e   :  { %v167_v55 = vadd.f32 %v162_v49, %v135_v47  ;;  %v171_v58 = vadd.f32 %v162_v49, %v139_v48  ;;  %v166_v59 = vadd.f32 %v157_v52, %v134_v45  ;;  %v170_v60 = vadd.f32 %v157_v52, %v138_v46 }
  0x90   :  { %175 = vst.msk [vmem:[#allocation2 + $0x18] sm:$0xff] %vm23_vm0, %v167_v55  ;;  %179 = vst.msk [vmem:[#allocation2 + $0x38] sm:$0xff] %vm23_vm0, %v171_v58 }
  0x91   :  { %174 = vst.msk [vmem:[#allocation2 + $0x10] sm:$0xff] %vm23_vm0, %v166_v59  ;;  %178 = vst.msk [vmem:[#allocation2 + $0x30] sm:$0xff] %vm23_vm0, %v170_v60 }
  0x92   :  { %217 = shalt.err (!%p214_p4)
}
  0x93   :  { %s218_s19 = scalar_lea.hbm %s341_s3, 1024 }
  0x94   :  { %p219_p5 = scmp.ne.s32.totalorder %s341_s3, %s218_s19  ;;  %p222_p6 = scmp.lt.u32.totalorder %s218_s19, %s341_s3 }
  0x96   :  { %p224_p7 = pnand %p222_p6, %p219_p5 }
  0x98   :  { %227 = shalt.err (!%p224_p7)
}
  0x99   :  { %s232_s24 = smov 128   ;;  %s233_s25 = smov 8  }
  0x9a   :  { %191 = dma.vmem_to_hbm [thread:$0]  %s186_s15, 1024, %s341_s3, [#allocation3], %s232_s24, %s232_s24, %s233_s25  }
  0x9b   :  { %228 = dma.done.wait [#allocation3], 1024  }
  0x9c   :  { %229 = vsyncadd [#allocation3], 4294966272 }
  0x9d   :  { %195 = vsyncpa [#allocation3], 1 }

</bundles_post_ra>
